<compile_context>
chip_gen: v7x
topology: tpu7x:2x2x1
jax: 0.10.0
libtpu: 0.0.40
codegen_flags: <defaults>
</compile_context>

<pallas_src>
import functools
import math

import jax
import jax.numpy as jnp
from jax.experimental import pallas as pl
from jax.experimental.pallas import tpu as pltpu

_MiB = 1024 * 1024


# ----------------------------------------------------------------------------- helpers

def _sublane_align(dtype):
    """Sublane alignment for the second-to-last dim: 8 (f32), 16 (bf16), 32 (8-bit)."""
    itemsize = jnp.dtype(dtype).itemsize
    if itemsize >= 4:
        return 8
    if itemsize == 2:
        return 16
    return 32


def _pick_tile(dim, pref, align):
    """Largest tile <= pref that evenly divides `dim` (aligned to `align`), else the full dim."""
    if dim <= pref:
        return dim
    if dim % pref == 0:
        return pref
    t = (pref // align) * align
    while t >= align:
        if dim % t == 0:
            return t
        t -= align
    # TODO(synk): pad ragged dims instead of falling back to one full-extent block.
    return dim


def _vmem_limit(estimate_bytes):
    # Explicit scoped-VMEM request: generous enough to keep double-buffering alive, capped
    # with headroom below v7x's 64 MiB physical VMEM (v5e/v6e have 128 MiB physical).
    return int(min(max(2 * estimate_bytes, 32 * _MiB), 48 * _MiB))


# ----------------------------------------------------------------------------- linear kernel

def _linear_kernel(x_ref, w_ref, b_ref, o_ref, acc_ref):
    # x: (tm, tk), w: (tk, tn) (pre-transposed), b: (1, tn), acc: (tm, tn) fp32.
    @pl.when(pl.program_id(2) == 0)
    def _():
        acc_ref[...] = jnp.zeros_like(acc_ref)

    acc_ref[...] += jnp.dot(x_ref[...], w_ref[...],
                            preferred_element_type=jnp.float32)

    @pl.when(pl.program_id(2) == pl.num_programs(2) - 1)
    def _():
        o_ref[...] = (acc_ref[...] + b_ref[...]).astype(o_ref.dtype)


def pallas_linear(x2d, w_t, b, *, compute_dtype=None, out_dtype=jnp.float32,
                  tm_pref=512, tn_pref=512, tk_pref=1024):
    """y = x2d @ w_t + b with x2d:(M, K), w_t:(K, N) (pre-transposed), b:(N,)."""
    M, K = x2d.shape
    K2, N = w_t.shape
    assert K == K2
    cdt = compute_dtype if compute_dtype is not None else x2d.dtype
    if x2d.dtype != cdt:
        x2d = x2d.astype(cdt)
    if w_t.dtype != cdt:
        w_t = w_t.astype(cdt)
    b2d = b.reshape(1, N).astype(jnp.float32)

    sub = _sublane_align(cdt)
    tm = _pick_tile(M, tm_pref, sub)
    tn = _pick_tile(N, tn_pref, 128)
    tk = _pick_tile(K, tk_pref, 128)

    cbytes = jnp.dtype(cdt).itemsize
    obytes = jnp.dtype(out_dtype).itemsize
    est = (2 * (tm * tk + tk * tn) * cbytes      # double-buffered x / w blocks
           + 2 * tm * tn * obytes                # double-buffered output block
           + tm * tn * 4 + 2 * tn * 4)           # fp32 accumulator scratch + bias

    grid = (M // tm, N // tn, K // tk)
    return pl.pallas_call(
        _linear_kernel,
        out_shape=jax.ShapeDtypeStruct((M, N), out_dtype),
        grid_spec=pltpu.PrefetchScalarGridSpec(
            num_scalar_prefetch=0,
            grid=grid,
            in_specs=[
                pl.BlockSpec((tm, tk), lambda i, j, kk: (i, kk)),
                pl.BlockSpec((tk, tn), lambda i, j, kk: (kk, j)),
                pl.BlockSpec((1, tn), lambda i, j, kk: (0, j)),
            ],
            out_specs=pl.BlockSpec((tm, tn), lambda i, j, kk: (i, j)),
            scratch_shapes=[pltpu.VMEM((tm, tn), jnp.float32)],
        ),
        compiler_params=pltpu.CompilerParams(
            dimension_semantics=("parallel", "parallel", "arbitrary"),
            vmem_limit_bytes=_vmem_limit(est)),
    )(x2d, w_t, b2d)


# ----------------------------------------------------------------------------- attention kernel

def _attn_kernel(q_ref, k_ref, v_ref, o_ref, *maybe_aw, num_heads, scale,
                 return_weights):
    # q_ref: (1, tq, D), k_ref/v_ref: (1, S, D), o_ref: (1, tq, D),
    # aw_ref (only when return_weights): (1, H, tq, S).
    aw_ref = maybe_aw[0] if return_weights else None

    q = q_ref[0] * scale          # fold 1/sqrt(depth) into q once per tile (VPU-cheap)
    k = k_ref[0]                  # (S, D)
    v = v_ref[0]                  # (S, D)
    depth = q.shape[-1] // num_heads

    outs = []
    for h in range(num_heads):    # static head loop
        sl = slice(h * depth, (h + 1) * depth)
        qh = q[:, sl]             # (tq, depth)
        kh = k[:, sl]             # (S, depth)
        vh = v[:, sl]             # (S, depth)

        # scores = qh @ kh^T ; contract last dims directly (no kh.T relayout), fp32 acc.
        scores = jax.lax.dot_general(
            qh, kh,
            dimension_numbers=(((1,), (1,)), ((), ())),
            preferred_element_type=jnp.float32)                      # (tq, S)

        # Numerically-stable softmax.
        m = jnp.max(scores, axis=-1, keepdims=True)
        e = jnp.exp(scores - m)
        denom = jnp.sum(e, axis=-1, keepdims=True)
        if return_weights:
            attn = e / denom      # exact: user-facing weights sum to 1
            aw_ref[0, h] = attn.astype(aw_ref.dtype)
        else:
            attn = e * pl.reciprocal(denom, approx=True)             # EUP slot, ~free

        outs.append(jnp.dot(attn.astype(vh.dtype), vh,
                            preferred_element_type=jnp.float32))     # (tq, depth)

    # One lane-dense (tq, D) store instead of H masked sub-128-lane stores.
    o_ref[0] = jnp.concatenate(outs, axis=-1).astype(o_ref.dtype)


def pallas_attention(q, k, v, num_heads, *, d_model=None, out_dtype=jnp.float32,
                     return_weights=True, aw_dtype=jnp.float32,
                     q_block=0, k_block=0, v_block=0):
    """Scaled dot-product attention over (B, S, D) tensors with heads packed in the last dim.

    q/k/v may all be the same packed (B, S, 3*D) QKV tensor; pass d_model=D and lane-block
    offsets q_block/k_block/v_block = 0/1/2 so the split happens in the BlockSpec index maps
    (no HBM slice copies). Returns (out (B, S, D), attn_weights (B, H, S, S) or None).
    """
    B, S, last = q.shape
    D = int(d_model) if d_model is not None else last
    depth = D // num_heads
    scale = 1.0 / math.sqrt(float(depth))

    in_bytes = jnp.dtype(q.dtype).itemsize
    out_bytes = jnp.dtype(out_dtype).itemsize
    aw_bytes = jnp.dtype(aw_dtype).itemsize if return_weights else 0
    sub = max(_sublane_align(q.dtype), _sublane_align(out_dtype))

    # Budget tq against a ~20 MiB double-buffered working set (K/V + q/o + aw blocks) so the
    # same tiling fits v7x (64 MiB physical VMEM) and v5e's small scoped default.
    # TODO(synk): online-softmax (flash) K/V tiling when attention weights are not requested.
    fixed = 2 * 2 * S * D * in_bytes                              # K + V full-sequence blocks
    per_row = (2 * D * (in_bytes + out_bytes)                     # q + o rows
               + 2 * num_heads * S * aw_bytes)                    # attn-weight rows
    budget = 20 * _MiB
    if budget > fixed:
        cap = max(sub, ((budget - fixed) // max(per_row, 1)) // sub * sub)
    else:
        cap = sub
    tq = _pick_tile(S, min(cap, 512), sub)
    est = fixed + tq * per_row

    grid = (B, S // tq)
    kernel = functools.partial(_attn_kernel, num_heads=num_heads, scale=scale,
                               return_weights=return_weights)

    q_spec = pl.BlockSpec((1, tq, D), lambda b, qi, _o=q_block: (b, qi, _o))
    k_spec = pl.BlockSpec((1, S, D), lambda b, qi, _o=k_block: (b, 0, _o))
    v_spec = pl.BlockSpec((1, S, D), lambda b, qi, _o=v_block: (b, 0, _o))
    o_spec = pl.BlockSpec((1, tq, D), lambda b, qi: (b, qi, 0))

    out_shape = [jax.ShapeDtypeStruct((B, S, D), out_dtype)]
    out_specs = [o_spec]
    if return_weights:
        out_shape.append(jax.ShapeDtypeStruct((B, num_heads, S, S), aw_dtype))
        out_specs.append(pl.BlockSpec((1, num_heads, tq, S), lambda b, qi: (b, 0, qi, 0)))

    results = pl.pallas_call(
        kernel,
        out_shape=tuple(out_shape),
        grid=grid,
        in_specs=[q_spec, k_spec, v_spec],
        out_specs=tuple(out_specs),
        compiler_params=pltpu.CompilerParams(
            dimension_semantics=("parallel", "parallel"),
            vmem_limit_bytes=_vmem_limit(est)),
    )(q, k, v)

    if return_weights:
        return results[0], results[1]
    return results[0], None


# ----------------------------------------------------------------------------- params

def init_params(key, d_model):
    """Deterministic init matching nn.Linear shapes: W (out, in), b (out,)."""
    bound = 1.0 / math.sqrt(d_model)
    keys = jax.random.split(key, 8)

    def u(kk, shape):
        return jax.random.uniform(kk, shape, jnp.float32, minval=-bound, maxval=bound)

    return {
        "wq_w": u(keys[0], (d_model, d_model)), "wq_b": u(keys[1], (d_model,)),
        "wk_w": u(keys[2], (d_model, d_model)), "wk_b": u(keys[3], (d_model,)),
        "wv_w": u(keys[4], (d_model, d_model)), "wv_b": u(keys[5], (d_model,)),
        "dense_w": u(keys[6], (d_model, d_model)), "dense_b": u(keys[7], (d_model,)),
    }


def prepare_params(params):
    """One-time (param-load) weight prep: pre-transposed to (in, out) layout plus a fused
    QKV weight, so no per-forward-call transpose/concatenate passes over the weights."""
    return {
        "wq_t": params["wq_w"].T, "wq_b": params["wq_b"],
        "wk_t": params["wk_w"].T, "wk_b": params["wk_b"],
        "wv_t": params["wv_w"].T, "wv_b": params["wv_b"],
        "dense_t": params["dense_w"].T, "dense_b": params["dense_b"],
        "w_qkv_t": jnp.concatenate(
            [params["wq_w"], params["wk_w"], params["wv_w"]], axis=0).T,   # (D, 3D)
        "b_qkv": jnp.concatenate(
            [params["wq_b"], params["wk_b"], params["wv_b"]], axis=0),     # (3D,)
    }


# ----------------------------------------------------------------------------- forward

def multi_head_attention_forward(v, k, q, prepared, num_heads, mask=None,
                                 compute_dtype=None,
                                 return_attention_weights=True,
                                 attention_weights_dtype=jnp.float32):
    """Mirrors MultiHeadAttention.forward(v, k, q, mask=None).

    v, k, q : (B, S, d_model)
    returns (output (B, S, d_model) float32, attention_weights (B, H, S, S) or None)
    """
    if mask is not None:
        # TODO(synk): additive mask (mask * -1e9 on the logits) not wired into the kernel.
        raise NotImplementedError("mask is not supported by the Pallas kernels yet")

    B, S, D = q.shape
    proj_dtype = compute_dtype if compute_dtype is not None else jnp.float32

    # NOTE: the fused-QKV fast path keys on object identity (q is k is v);
    # equal-but-distinct arrays take the 3-kernel path (correct, just slower).
    if (q is k) and (k is v):
        qkv = pallas_linear(q.reshape(B * S, D), prepared["w_qkv_t"], prepared["b_qkv"],
                            compute_dtype=compute_dtype,
                            out_dtype=proj_dtype).reshape(B, S, 3 * D)
        if D % 128 == 0:
            # Lane-block offsets 0 / D / 2D selected by the BlockSpec index maps:
            # no HBM slice round-trips for the QKV split.
            attn_out, attn_w = pallas_attention(
                qkv, qkv, qkv, num_heads, d_model=D, out_dtype=proj_dtype,
                return_weights=return_attention_weights,
                aw_dtype=attention_weights_dtype,
                q_block=0, k_block=1, v_block=2)
        else:
            q_p, k_p, v_p = qkv[..., :D], qkv[..., D:2 * D], qkv[..., 2 * D:]
            attn_out, attn_w = pallas_attention(
                q_p, k_p, v_p, num_heads, out_dtype=proj_dtype,
                return_weights=return_attention_weights,
                aw_dtype=attention_weights_dtype)
    else:
        q_p = pallas_linear(q.reshape(B * S, D), prepared["wq_t"], prepared["wq_b"],
                            compute_dtype=compute_dtype,
                            out_dtype=proj_dtype).reshape(B, S, D)
        k_p = pallas_linear(k.reshape(B * S, D), prepared["wk_t"], prepared["wk_b"],
                            compute_dtype=compute_dtype,
                            out_dtype=proj_dtype).reshape(B, S, D)
        v_p = pallas_linear(v.reshape(B * S, D), prepared["wv_t"], prepared["wv_b"],
                            compute_dtype=compute_dtype,
                            out_dtype=proj_dtype).reshape(B, S, D)
        attn_out, attn_w = pallas_attention(
            q_p, k_p, v_p, num_heads, out_dtype=proj_dtype,
            return_weights=return_attention_weights,
            aw_dtype=attention_weights_dtype)

    out = pallas_linear(attn_out.reshape(B * S, D), prepared["dense_t"], prepared["dense_b"],
                        compute_dtype=compute_dtype, out_dtype=jnp.float32).reshape(B, S, D)
    return out, attn_w


# ----------------------------------------------------------------------------- reference (pure JAX)

def reference_forward(v, k, q, params, num_heads):
    B, S, D = q.shape
    depth = D // num_heads
    lin = lambda x, w, b: x @ w.T + b
    qp = lin(q, params["wq_w"], params["wq_b"])
    kp = lin(k, params["wk_w"], params["wk_b"])
    vp = lin(v, params["wv_w"], params["wv_b"])
    sh = lambda x: x.reshape(B, S, num_heads, depth).transpose(0, 2, 1, 3)
    qh, kh, vh = sh(qp), sh(kp), sh(vp)
    scores = jnp.einsum("bhqd,bhkd->bhqk", qh, kh) / math.sqrt(depth)
    attn = jax.nn.softmax(scores, axis=-1)
    out = jnp.einsum("bhqk,bhkd->bhqd", attn, vh)
    merged = out.transpose(0, 2, 1, 3).reshape(B, S, D)
    return lin(merged, params["dense_w"], params["dense_b"]), attn


# ----------------------------------------------------------------------------- main

if __name__ == "__main__":
    B, S, d_model, num_heads = 2, 8, 32, 4

    key = jax.random.PRNGKey(0)
    kq, kk, kv, kp = jax.random.split(key, 4)
    q = jax.random.normal(kq, (B, S, d_model), jnp.float32)
    k = jax.random.normal(kk, (B, S, d_model), jnp.float32)
    v = jax.random.normal(kv, (B, S, d_model), jnp.float32)
    params = init_params(kp, d_model)
    prepared = prepare_params(params)   # one-time weight prep (param-load time)

    TOL = dict(atol=2e-2, rtol=2e-2)

    # --- cross-attention path (distinct q/k/v -> three tiled projection kernels) ---
    out, attn_w = multi_head_attention_forward(v, k, q, prepared, num_heads)
    out = jax.block_until_ready(out)
    attn_w = jax.block_until_ready(attn_w)
    ref_out, ref_attn = reference_forward(v, k, q, params, num_heads)
    assert out.shape == (B, S, d_model) and attn_w.shape == (B, num_heads, S, S)
    assert jnp.allclose(out, ref_out, **TOL)
    assert jnp.allclose(attn_w, ref_attn, **TOL)

    # --- self-attention path (q is k is v -> fused QKV projection kernel) ---
    x = q
    out_sa, attn_sa = multi_head_attention_forward(x, x, x, prepared, num_heads)
    out_sa = jax.block_until_ready(out_sa)
    attn_sa = jax.block_until_ready(attn_sa)
    ref_out_sa, ref_attn_sa = reference_forward(x, x, x, params, num_heads)
    assert jnp.allclose(out_sa, ref_out_sa, **TOL)
    assert jnp.allclose(attn_sa, ref_attn_sa, **TOL)

    # --- bf16 compute, no attention-weights writeback (fast inference path) ---
    out_bf, attn_none = multi_head_attention_forward(
        x, x, x, prepared, num_heads, compute_dtype=jnp.bfloat16,
        return_attention_weights=False)
    out_bf = jax.block_until_ready(out_bf)
    assert attn_none is None
    assert out_bf.dtype == jnp.float32
    assert jnp.allclose(out_bf, ref_out_sa, atol=1e-1, rtol=1e-1)

    print("KERNEL_OK")
</pallas_src>

<mosaic_0001>
module attributes {stable_mosaic.version = 11 : i64} {
  func.func @_linear_kernel(%arg0: i32, %arg1: i32, %arg2: i32, %arg3: memref<16x32xf32, #tpu.memory_space<vmem>>, %arg4: memref<32x32xf32, #tpu.memory_space<vmem>>, %arg5: memref<1x32xf32, #tpu.memory_space<vmem>>, %arg6: memref<16x32xf32, #tpu.memory_space<vmem>>, %arg7: memref<16x32xf32, #tpu.memory_space<vmem>>) attributes {dimension_semantics = [#tpu.dimension_semantics<parallel>, #tpu.dimension_semantics<parallel>, #tpu.dimension_semantics<arbitrary>], iteration_bounds = array<i64: 1, 1, 1>, scalar_prefetch = 0 : i64, scratch_operands = 1 : i64, tpu.core_type = #tpu.core_type<tc>, window_params = [{transform_indices = @transform_0, window_bounds = array<i64: 16, 32>}, {transform_indices = @transform_1, window_bounds = array<i64: 32, 32>}, {transform_indices = @transform_2, window_bounds = array<i64: 1, 32>}, {transform_indices = @transform_3, window_bounds = array<i64: 16, 32>}]} {
    %c0_i32 = arith.constant 0 : i32
    %0 = arith.cmpi eq, %arg2, %c0_i32 : i32
    %1 = arith.extui %0 : i1 to i32
    %c0_i32_0 = arith.constant 0 : i32
    %2 = arith.cmpi ne, %1, %c0_i32_0 : i32
    scf.if %2 {
      %cst_10 = arith.constant 0.000000e+00 : f32
      %12 = vector.broadcast %cst_10 : f32 to vector<16x32xf32>
      %c0_11 = arith.constant 0 : index
      %c0_12 = arith.constant 0 : index
      %13 = vector.load %arg7[%c0_11, %c0_12] : memref<16x32xf32, #tpu.memory_space<vmem>>, vector<16x32xf32>
      tpu.vector_store %arg7[%c0_11, %c0_12], %12 {strides = array<i32>} : memref<16x32xf32, #tpu.memory_space<vmem>>, vector<16x32xf32>,
    } else {
    }
    %c0 = arith.constant 0 : index
    %c0_1 = arith.constant 0 : index
    %3 = vector.load %arg7[%c0, %c0_1] : memref<16x32xf32, #tpu.memory_space<vmem>>, vector<16x32xf32>
    %c0_2 = arith.constant 0 : index
    %c0_3 = arith.constant 0 : index
    %4 = vector.load %arg3[%c0_2, %c0_3] : memref<16x32xf32, #tpu.memory_space<vmem>>, vector<16x32xf32>
    %c0_4 = arith.constant 0 : index
    %c0_5 = arith.constant 0 : index
    %5 = vector.load %arg4[%c0_4, %c0_5] : memref<32x32xf32, #tpu.memory_space<vmem>>, vector<32x32xf32>
    %cst = arith.constant dense<0.000000e+00> : vector<16x32xf32>
    %6 = tpu.matmul %4, %5, %cst {dimension_numbers = #tpu.dot_dimension_numbers<[1], [0], [0], [1], [0, 0, 1, 1], [], []>} : vector<16x32xf32>, vector<32x32xf32>, vector<16x32xf32> -> vector<16x32xf32>
    %7 = arith.addf %3, %6 : vector<16x32xf32>
    %c0_6 = arith.constant 0 : index
    %c0_7 = arith.constant 0 : index
    %8 = vector.load %arg7[%c0_6, %c0_7] : memref<16x32xf32, #tpu.memory_space<vmem>>, vector<16x32xf32>
    tpu.vector_store %arg7[%c0_6, %c0_7], %7 {strides = array<i32>} : memref<16x32xf32, #tpu.memory_space<vmem>>, vector<16x32xf32>,
    %c0_i32_8 = arith.constant 0 : i32
    %9 = arith.cmpi eq, %arg2, %c0_i32_8 : i32
    %10 = arith.extui %9 : i1 to i32
    %c0_i32_9 = arith.constant 0 : i32
    %11 = arith.cmpi ne, %10, %c0_i32_9 : i32
    scf.if %11 {
      %c0_10 = arith.constant 0 : index
      %c0_11 = arith.constant 0 : index
      %12 = vector.load %arg7[%c0_10, %c0_11] : memref<16x32xf32, #tpu.memory_space<vmem>>, vector<16x32xf32>
      %c0_12 = arith.constant 0 : index
      %c0_13 = arith.constant 0 : index
      %13 = vector.load %arg5[%c0_12, %c0_13] : memref<1x32xf32, #tpu.memory_space<vmem>>, vector<1x32xf32>
      %14 = vector.broadcast %13 : vector<1x32xf32> to vector<16x32xf32>
      %15 = arith.addf %12, %14 : vector<16x32xf32>
      %c0_14 = arith.constant 0 : index
      %c0_15 = arith.constant 0 : index
      %16 = vector.load %arg6[%c0_14, %c0_15] : memref<16x32xf32, #tpu.memory_space<vmem>>, vector<16x32xf32>
      tpu.vector_store %arg6[%c0_14, %c0_15], %15 {strides = array<i32>} : memref<16x32xf32, #tpu.memory_space<vmem>>, vector<16x32xf32>,
    } else {
    }
    return
  }
  func.func @transform_0(%arg0: i32, %arg1: i32, %arg2: i32) -> (i32, i32) {
    %c0_i32 = arith.constant 0 : i32
    return %arg0, %arg2 : i32, i32
  }
  func.func @transform_1(%arg0: i32, %arg1: i32, %arg2: i32) -> (i32, i32) {
    %c0_i32 = arith.constant 0 : i32
    return %arg2, %arg1 : i32, i32
  }
  func.func @transform_2(%arg0: i32, %arg1: i32, %arg2: i32) -> (i32, i32) {
    %c0_i32 = arith.constant 0 : i32
    %c0_i32_0 = arith.constant 0 : i32
    return %c0_i32, %arg1 : i32, i32
  }
  func.func @transform_3(%arg0: i32, %arg1: i32, %arg2: i32) -> (i32, i32) {
    %c0_i32 = arith.constant 0 : i32
    return %arg0, %arg1 : i32, i32
  }
}

</mosaic_0001>

<bundles_post_ra>
// kernel: tpu_custom_call.1
= control target key start
LH: loop header
LB: loop body
LE: loop exit
PB: predicated region body
PF: predicated region fallthrough
CT: control target
= control target key end

     0   :  { %8 = vsyncpa [#allocation4], 0  ;;  %s366_s0 = inlined_call_operand.hbm [shape: f32[16,32], index: 0, kind: input, shape index: {}]   ;;  %s367_s1 = inlined_call_operand.hbm [shape: f32[32,32], index: 1, kind: input, shape index: {}]   ;;  %s368_s2 = inlined_call_operand.vmem [shape: f32[1,32], index: 2, kind: input, shape index: {}]   ;;  %s369_s3 = inlined_call_operand.hbm [shape: f32[16,32], index: 3, kind: output, shape index: {}]  }
   0x1   :  { %9 = vsyncpa [#allocation7], 0 }
   0x2   :  { %10 = vsyncpa [#allocation5], 0  ;;  %s284_s12 = smov [#allocation3]   ;;  %s212_s16 = scalar_lea.hbm %s366_s0, 256 }
   0x3   :  { %s16_s13 = sshll.u32 %s284_s12, 4  ;;  %p213_p0 = scmp.ne.s32.totalorder %s366_s0, %s212_s16  ;;  %s17_s13 = int_to_ptr.vmem [resolvable:$true] %s16_s13 }
   0x4   :  { %p216_p1 = scmp.lt.u32.totalorder %s212_s16, %s366_s0 }
   0x6   :  { %p218_p2 = pnand %p216_p1, %p213_p0 }
   0x8   :  { %221 = shalt.err (!%p218_p2)
}
   0x9   :  { %s222_s21 = scalar_lea.vmem %s17_s13, 256  ;;  %p227_p4 = scmp.lt.s32.totalorder %s17_s13, %s17_s13 }
   0xa   :  { %p223_p3 = scmp.ne.s32.totalorder %s17_s13, %s222_s21  ;;  %p228_p5 = scmp.lt.s32.totalorder %s222_s21, %s222_s21 }
   0xc   :  { %p229_p6 = por %p228_p5, %p227_p4 }
   0xe   :  { %p230_p7 = pnand %p229_p6, %p223_p3 }
  0x10   :  { %233 = shalt.err (!%p230_p7)
}
  0x11   :  { %s285_s22 = smov 128   ;;  %s286_s23 = smov 8  }
  0x12   :  { %22 = dma.hbm_to_vmem [thread:$0]  %s366_s0, 256, %s17_s13, [#allocation4], %s285_s22, %s285_s22, %s286_s23  }
  0x13   :  { %s287_s26 = smov [#allocation6]   ;;  %s234_s30 = scalar_lea.hbm %s367_s1, 512 }
  0x14   :  { %s28_s27 = sshll.u32 %s287_s26, 4  ;;  %p235_p8 = scmp.ne.s32.totalorder %s367_s1, %s234_s30  ;;  %s29_s27 = int_to_ptr.vmem [resolvable:$true] %s28_s27 }
  0x15   :  { %p238_p9 = scmp.lt.u32.totalorder %s234_s30, %s367_s1 }
  0x17   :  { %p240_p10 = pnand %p238_p9, %p235_p8 }
  0x19   :  { %243 = shalt.err (!%p240_p10)
}
  0x1a   :  { %s244_s8 = scalar_lea.vmem %s29_s27, 512  ;;  %p249_p12 = scmp.lt.s32.totalorder %s29_s27, %s29_s27 }
  0x1b   :  { %p245_p11 = scmp.ne.s32.totalorder %s29_s27, %s244_s8  ;;  %p250_p13 = scmp.lt.s32.totalorder %s244_s8, %s244_s8 }
  0x1d   :  { %p251_p0 = por %p250_p13, %p249_p12 }
  0x1f   :  { %p252_p1 = pnand %p251_p0, %p245_p11 }
  0x21   :  { %255 = shalt.err (!%p252_p1)
}
  0x22   :  { %34 = dma.hbm_to_vmem [thread:$0]  %s367_s1, 512, %s29_s27, [#allocation7], %s285_s22, %s285_s22, %s286_s23  }
  0x23   :  { %278 = dma.done.wait [#allocation4], 256  }
  0x24   :  { %279 = vsyncadd [#allocation4], 4294967040 }
  0x25   :  { %280 = dma.done.wait [#allocation7], 512  }
  0x26   :  { %281 = vsyncadd [#allocation7], 4294966784  ;;  %vm47_vm0 = vcmask 261120   ;;  %v288_v0 = vmov 0.0   ;;  %v54_v1 = vld [vmem:[#allocation6] sm:$0xff]  ;;  %v55_v2 = vld [vmem:[#allocation6 + $0x8] sm:$0xff] }
  0x27   :  { %49 = vst.msk [vmem:[#allocation2 + $0x8] sm:$0xff] %vm47_vm0, %v288_v0  ;;  %48 = vst.msk [vmem:[#allocation2] sm:$0xff] %vm47_vm0, %v288_v0  ;;  %v56_v3 = vld [vmem:[#allocation6 + $0x10] sm:$0xff]  ;;  %v198_v4 = vpack.c.bf16 %v55_v2, %v54_v1  ;;  %v57_v5 = vld [vmem:[#allocation6 + $0x18] sm:$0xff]  ;;  %s289_s11 = smov [#allocation8]  }
  0x28   :  { %v52_v6 = vld [vmem:[#allocation3] sm:$0xff]  ;;  %v202_v7 = vpack.c.bf16 %v57_v5, %v56_v3  ;;  %v53_v8 = vld [vmem:[#allocation3 + $0x8] sm:$0xff]  ;;  %v180_v15 = vld [vmem:[%s368_s2] ss:$0 sm:$0xff]  ;;  %s165_s12 = sshll.u32 %s289_s11, 4  ;;  %s166_s12 = int_to_ptr.vmem [resolvable:$true] %s165_s12 }
  0x29   :  { %195 = vmatprep.mubr.msk.f32.mxu0 %vm47_vm0, %v52_v6  ;;  %199 = vmatprep.subr.bf16.mxu0 %v198_v4  ;;  %s256_s13 = scalar_lea.vmem %s166_s12, 256  ;;  %p261_p3 = scmp.lt.s32.totalorder %s166_s12, %s166_s12 }
  0x2a   :  { %201 = vmatpush3.bf16.msra.mxu0 %v198_v4  ;;  %p257_p2 = scmp.ne.s32.totalorder %s166_s12, %s256_s13  ;;  %p262_p4 = scmp.lt.s32.totalorder %s256_s13, %s256_s13 }
  0x2b   :  { %203 = vmatprep.subr.bf16.mxu0 %v202_v7 }
  0x2c   :  { %p263_p5 = por %p262_p4, %p261_p3 }
  0x2e   :  { %205 = vmatpush3.bf16.msra.mxu0 %v202_v7  ;;  %v51_v9 = vld [vmem:[#allocation2 + $0x8] sm:$0xff]  ;;  %v50_v10 = vld [vmem:[#allocation2] sm:$0xff]  ;;  %p264_p6 = pnand %p263_p5, %p257_p2 }
  0x31   :  { %196 = vmatmul.mubr.msk.f32.vlgmr.msra.gmra.mrb[0].mxu0 %vm47_vm0, %v53_v8 }
 0x104   :  { %v197_v11 = vpop.f32.mrb[0].mxu0 }
 0x105   :  { %v141_v12 = vadd.f32 %v197_v11, %v51_v9  ;;  %v131_v13 = vpop.f32.mrb[1].mxu0 }
 0x106   :  { %v140_v14 = vadd.f32 %v131_v13, %v50_v10 }
 0x107   :  { %143 = vst.msk [vmem:[#allocation2 + $0x8] sm:$0xff] %vm47_vm0, %v141_v12 }
 0x108   :  { %142 = vst.msk [vmem:[#allocation2] sm:$0xff] %vm47_vm0, %v140_v14 }
 0x10e   :  { %v148_v16 = vld [vmem:[#allocation2 + $0x8] sm:$0xff] }
 0x10f   :  { %v147_v17 = vld [vmem:[#allocation2] sm:$0xff]  ;;  %v157_v18 = vadd.f32 %v180_v15, %v148_v16 }
 0x110   :  { %v156_v19 = vadd.f32 %v180_v15, %v147_v17 }
 0x111   :  { %159 = vst.msk [vmem:[#allocation8 + $0x8] sm:$0xff] %vm47_vm0, %v157_v18 }
 0x112   :  { %158 = vst.msk [vmem:[#allocation8] sm:$0xff] %vm47_vm0, %v156_v19 }
 0x113   :  { %267 = shalt.err (!%p264_p6)
}
 0x114   :  { %s268_s15 = scalar_lea.hbm %s369_s3, 256 }
 0x115   :  { %p269_p7 = scmp.ne.s32.totalorder %s369_s3, %s268_s15  ;;  %p272_p8 = scmp.lt.u32.totalorder %s268_s15, %s369_s3 }
 0x117   :  { %p274_p9 = pnand %p272_p8, %p269_p7 }
 0x119   :  { %277 = shalt.err (!%p274_p9)
}
 0x11a   :  { %171 = dma.vmem_to_hbm [thread:$0]  %s166_s12, 256, %s369_s3, [#allocation5], %s285_s22, %s285_s22, %s286_s23  }
 0x11b   :  { %282 = dma.done.wait [#allocation5], 256  }
 0x11c   :  { %283 = vsyncadd [#allocation5], 4294967040 }
 0x11d   :  { %175 = vsyncpa [#allocation4], 1 }
 0x11e   :  { %176 = vsyncpa [#allocation7], 1 }
 0x11f   :  { %177 = vsyncpa [#allocation5], 1 }

</bundles_post_ra>
